<compile_context>
chip_gen: v5e
topology: v5e:2x2
jax: 0.10.0
libtpu: 0.0.40
codegen_flags: <defaults>
</compile_context>

<pallas_src>
import jax
import jax.numpy as jnp
from jax.experimental import pallas as pl
from jax.experimental.pallas import tpu as pltpu


def _attn_pool_kernel(x_ref, mask_ref, w1_ref, b1_ref, w2r_ref, b2_ref, o_ref):
    # x_ref: (TB, S, E) input dtype; mask_ref: (TB, S); w1_ref: (E, H) input dtype
    # b1_ref: (1, H) f32; w2r_ref: (1, H) f32 (lane-dense row); b2_ref: (1, 1) f32
    # o_ref: (TB, E)
    TB, S, E = x_ref.shape
    H = w1_ref.shape[1]

    x3d = x_ref[...]                                   # (TB, S, E)
    x2d = x3d.reshape(TB * S, E)                       # leading-dim collapse (no copy)

    # fc1 on the MXU: operands stay in the input dtype (bf16 ok), f32 accumulation.
    e = jnp.tanh(
        jnp.dot(x2d, w1_ref[...], preferred_element_type=jnp.float32)
        + b1_ref[...].astype(jnp.float32)              # (1, H) broadcast over TB*S
    )                                                  # (TB*S, H) f32

    # fc2 as VPU multiply + lane reduce (avoids an N=1 MXU matmul).
    e3 = e.reshape(TB, S, H)                           # leading-dim split (no copy)
    w2row = w2r_ref[...].astype(jnp.float32).reshape(1, 1, H)
    logit = jnp.sum(e3 * w2row, axis=-1) + b2_ref[0, 0]   # (TB, S) f32

    # exp (no max-subtraction, faithful to the PyTorch module), mask, normalize.
    alpha = jnp.exp(logit) * mask_ref[...].astype(jnp.float32)     # (TB, S)
    denom = jnp.sum(alpha, axis=1, keepdims=True) + 1e-8           # (TB, 1)
    alpha = alpha / denom                                          # (TB, S)

    # Weighted sum over S (elementwise in f32; lane dim E stays dense).
    out = jnp.sum(x3d.astype(jnp.float32) * alpha[:, :, None], axis=1)   # (TB, E)
    o_ref[...] = out.astype(o_ref.dtype)


def attention_pooling(x, w1, b1, w2, b2, attn_mask=None, *, block_rows=None):
    """x: (B, S, E) f32/bf16; attn_mask: (B, S) or None. Returns (B, E) in x.dtype."""
    B, S, E = x.shape
    H = w1.shape[1]

    if attn_mask is None:
        attn_mask = jnp.ones((B, S), dtype=jnp.float32)

    # Keep fc1 operands in the input dtype (bf16 halves HBM traffic + 2x MXU density
    # on v6e/v7x); keep biases / w2 row / all elementwise math in f32 (v5e-safe).
    w1 = w1.astype(x.dtype)
    b1_2d = b1.reshape(1, H).astype(jnp.float32)
    w2_row = jnp.asarray(w2).reshape(1, H).astype(jnp.float32)   # lane-dense (1, H)
    b2_2d = jnp.asarray(b2).reshape(1, 1).astype(jnp.float32)

    # Batch-tile sizing: ~2 MiB of x per tile (BlockSpec double-buffers -> ~4 MiB),
    # well inside the 64 MiB VMEM of v7x and the 128 MiB of v5e/v6e.
    if block_rows is None:
        target_bytes = 2 * 1024 * 1024
        tb = max(1, target_bytes // (S * E * x.dtype.itemsize))
    else:
        tb = int(block_rows)
    tb = min(tb, B)
    if tb < B:
        # Partial tiles of B: keep the sublane-facing dim a multiple of 8.
        tb = min(B, max(8, (tb // 8) * 8))

    grid = (pl.cdiv(B, tb),)

    return pl.pallas_call(
        _attn_pool_kernel,
        out_shape=jax.ShapeDtypeStruct((B, E), x.dtype),
        grid_spec=pltpu.PrefetchScalarGridSpec(
            num_scalar_prefetch=0,
            grid=grid,
            in_specs=[
                pl.BlockSpec((tb, S, E), lambda b: (b, 0, 0)),   # x: TB batch rows
                pl.BlockSpec((tb, S),    lambda b: (b, 0)),      # mask
                pl.BlockSpec((E, H),     lambda b: (0, 0)),      # w1 (resident)
                pl.BlockSpec((1, H),     lambda b: (0, 0)),      # b1
                pl.BlockSpec((1, H),     lambda b: (0, 0)),      # w2 as lane-dense row
                pl.BlockSpec((1, 1),     lambda b: (0, 0)),      # b2
            ],
            out_specs=pl.BlockSpec((tb, E), lambda b: (b, 0)),
        ),
        compiler_params=pltpu.CompilerParams(
            dimension_semantics=("parallel",),        # shards batch tiles across TCs on v7x
            vmem_limit_bytes=32 * 1024 * 1024,        # explicit; leaves headroom on v7x (64 MiB)
        ),
    )(x, attn_mask, w1, b1_2d, w2_row, b2_2d)


def _reference(x, w1, b1, w2, b2, attn_mask=None):
    e = jnp.tanh(x @ w1 + b1)                         # (B, S, H)
    alpha = jnp.exp(e @ jnp.asarray(w2).reshape(-1, 1) + jnp.asarray(b2).reshape(1, 1))
    if attn_mask is not None:
        alpha = alpha * attn_mask[..., None]
    alpha = alpha / (jnp.sum(alpha, axis=1, keepdims=True) + 1e-8)
    return jnp.einsum("bse,bsx->be", x, alpha)


if __name__ == "__main__":
    key = jax.random.PRNGKey(0)

    # ---------- small config (matches module docstring scale), f32 ----------
    B, S, E, H = 2, 8, 32, 32
    k_x, k_m, k_w1, k_b1, k_w2, k_b2 = jax.random.split(key, 6)
    x = jax.random.normal(k_x, (B, S, E), dtype=jnp.float32)
    attn_mask = (jax.random.uniform(k_m, (B, S)) > 0.25).astype(jnp.float32)
    # PyTorch Linear stores (out, in) -> transpose to (in, out).
    w1 = (jax.random.normal(k_w1, (H, E), dtype=jnp.float32) * 0.1).T     # (E, H)
    b1 = jax.random.normal(k_b1, (H,), dtype=jnp.float32) * 0.1
    w2 = (jax.random.normal(k_w2, (1, H), dtype=jnp.float32) * 0.1).T     # (H, 1)
    b2 = jax.random.normal(k_b2, (1,), dtype=jnp.float32) * 0.1

    out = jax.block_until_ready(attention_pooling(x, w1, b1, w2, b2, attn_mask))
    ref = _reference(x, w1, b1, w2, b2, attn_mask)
    assert out.shape == (B, E), out.shape
    assert jnp.allclose(out, ref, atol=1e-5, rtol=1e-5), float(jnp.max(jnp.abs(out - ref)))

    # mask=None path
    out_nm = jax.block_until_ready(attention_pooling(x, w1, b1, w2, b2, None))
    ref_nm = _reference(x, w1, b1, w2, b2, None)
    assert jnp.allclose(out_nm, ref_nm, atol=1e-5, rtol=1e-5)

    # ---------- larger config: multi-step batch-tiled grid, f32 ----------
    B2, S2, E2, H2 = 256, 16, 64, 64
    k = jax.random.split(jax.random.PRNGKey(1), 6)
    x2 = jax.random.normal(k[0], (B2, S2, E2), dtype=jnp.float32)
    m2 = (jax.random.uniform(k[1], (B2, S2)) > 0.25).astype(jnp.float32)
    w12 = (jax.random.normal(k[2], (H2, E2), dtype=jnp.float32) * 0.1).T
    b12 = jax.random.normal(k[3], (H2,), dtype=jnp.float32) * 0.1
    w22 = (jax.random.normal(k[4], (1, H2), dtype=jnp.float32) * 0.1).T
    b22 = jax.random.normal(k[5], (1,), dtype=jnp.float32) * 0.1

    out2 = jax.block_until_ready(
        attention_pooling(x2, w12, b12, w22, b22, m2, block_rows=64))   # grid = (4,)
    ref2 = _reference(x2, w12, b12, w22, b22, m2)
    assert out2.shape == (B2, E2)
    assert jnp.allclose(out2, ref2, atol=1e-4, rtol=1e-4), float(jnp.max(jnp.abs(out2 - ref2)))

    # ---------- same config with bf16 MXU operands (f32 accumulation) ----------
    xb = x2.astype(jnp.bfloat16)
    w1b = w12.astype(jnp.bfloat16)
    outb = jax.block_until_ready(
        attention_pooling(xb, w1b, b12, w22, b22, m2, block_rows=64))
    refb = _reference(xb.astype(jnp.float32), w1b.astype(jnp.float32), b12, w22, b22, m2)
    assert jnp.allclose(outb.astype(jnp.float32), refb, atol=5e-2, rtol=5e-2), \
        float(jnp.max(jnp.abs(outb.astype(jnp.float32) - refb)))

    print("KERNEL_OK")
</pallas_src>

<mosaic_0001>
module attributes {stable_mosaic.version = 11 : i64} {
  func.func @_attn_pool_kernel(%arg0: i32, %arg1: memref<2x8x32xf32, #tpu.memory_space<vmem>>, %arg2: memref<2x8xf32, #tpu.memory_space<vmem>>, %arg3: memref<32x32xf32, #tpu.memory_space<vmem>>, %arg4: memref<1x32xf32, #tpu.memory_space<vmem>>, %arg5: memref<1x32xf32, #tpu.memory_space<vmem>>, %arg6: memref<1x1xf32, #tpu.memory_space<vmem>>, %arg7: memref<2x32xf32, #tpu.memory_space<vmem>>) attributes {dimension_semantics = [#tpu.dimension_semantics<parallel>], iteration_bounds = array<i64: 1>, scalar_prefetch = 0 : i64, scratch_operands = 0 : i64, tpu.core_type = #tpu.core_type<tc>, window_params = [{transform_indices = @transform_0, window_bounds = array<i64: 2, 8, 32>}, {transform_indices = @transform_1, window_bounds = array<i64: 2, 8>}, {pipeline_mode = #tpu.pipeline_mode<synchronous>, transform_indices = @transform_2, window_bounds = array<i64: 32, 32>}, {pipeline_mode = #tpu.pipeline_mode<synchronous>, transform_indices = @transform_3, window_bounds = array<i64: 1, 32>}, {pipeline_mode = #tpu.pipeline_mode<synchronous>, transform_indices = @transform_4, window_bounds = array<i64: 1, 32>}, {pipeline_mode = #tpu.pipeline_mode<synchronous>, transform_indices = @transform_5, window_bounds = array<i64: 1, 1>}, {transform_indices = @transform_6, window_bounds = array<i64: 2, 32>}]} {
    %c0 = arith.constant 0 : index
    %c0_0 = arith.constant 0 : index
    %c0_1 = arith.constant 0 : index
    %0 = vector.load %arg1[%c0, %c0_0, %c0_1] : memref<2x8x32xf32, #tpu.memory_space<vmem>>, vector<2x8x32xf32>
    %1 = vector.shape_cast %0 : vector<2x8x32xf32> to vector<16x32xf32>
    %c0_2 = arith.constant 0 : index
    %c0_3 = arith.constant 0 : index
    %2 = vector.load %arg3[%c0_2, %c0_3] : memref<32x32xf32, #tpu.memory_space<vmem>>, vector<32x32xf32>
    %cst = arith.constant dense<0.000000e+00> : vector<16x32xf32>
    %3 = tpu.matmul %1, %2, %cst {dimension_numbers = #tpu.dot_dimension_numbers<[1], [0], [0], [1], [0, 0, 1, 1], [], []>} : vector<16x32xf32>, vector<32x32xf32>, vector<16x32xf32> -> vector<16x32xf32>
    %c0_4 = arith.constant 0 : index
    %c0_5 = arith.constant 0 : index
    %4 = vector.load %arg4[%c0_4, %c0_5] : memref<1x32xf32, #tpu.memory_space<vmem>>, vector<1x32xf32>
    %5 = vector.broadcast %4 : vector<1x32xf32> to vector<16x32xf32>
    %6 = arith.addf %3, %5 : vector<16x32xf32>
    %7 = math.tanh %6 : vector<16x32xf32>
    %8 = vector.shape_cast %7 : vector<16x32xf32> to vector<2x8x32xf32>
    %c0_6 = arith.constant 0 : index
    %c0_7 = arith.constant 0 : index
    %9 = vector.load %arg5[%c0_6, %c0_7] : memref<1x32xf32, #tpu.memory_space<vmem>>, vector<1x32xf32>
    %10 = vector.shape_cast %9 : vector<1x32xf32> to vector<1x1x32xf32>
    %11 = vector.broadcast %10 : vector<1x1x32xf32> to vector<2x8x32xf32>
    %12 = arith.mulf %8, %11 : vector<2x8x32xf32>
    %cst_8 = arith.constant dense<0.000000e+00> : vector<2x8xf32>
    %13 = vector.multi_reduction <add>, %12, %cst_8 [2] : vector<2x8x32xf32> to vector<2x8xf32>
    %c0_9 = arith.constant 0 : index
    %c0_10 = arith.constant 0 : index
    %14 = vector.load %arg6[%c0_9, %c0_10] : memref<1x1xf32, #tpu.memory_space<vmem>>, vector<1x1xf32>
    %15 = vector.extract %14[0, 0] : f32 from vector<1x1xf32>
    %16 = vector.broadcast %15 : f32 to vector<2x8xf32>
    %17 = arith.addf %13, %16 : vector<2x8xf32>
    %18 = math.exp %17 : vector<2x8xf32>
    %c0_11 = arith.constant 0 : index
    %c0_12 = arith.constant 0 : index
    %19 = vector.load %arg2[%c0_11, %c0_12] : memref<2x8xf32, #tpu.memory_space<vmem>>, vector<2x8xf32>
    %20 = arith.mulf %18, %19 : vector<2x8xf32>
    %cst_13 = arith.constant dense<0.000000e+00> : vector<2xf32>
    %21 = vector.multi_reduction <add>, %20, %cst_13 [1] : vector<2x8xf32> to vector<2xf32>
    %22 = vector.shape_cast %21 : vector<2xf32> to vector<2x1xf32>
    %cst_14 = arith.constant 9.99999993E-9 : f32
    %23 = vector.broadcast %cst_14 : f32 to vector<2x1xf32>
    %24 = arith.addf %22, %23 : vector<2x1xf32>
    %25 = vector.broadcast %24 : vector<2x1xf32> to vector<2x8xf32>
    %26 = arith.divf %20, %25 : vector<2x8xf32>
    %27 = vector.shape_cast %26 : vector<2x8xf32> to vector<2x8x1xf32>
    %28 = vector.broadcast %27 : vector<2x8x1xf32> to vector<2x8x32xf32>
    %29 = arith.mulf %0, %28 : vector<2x8x32xf32>
    %cst_15 = arith.constant dense<0.000000e+00> : vector<2x32xf32>
    %30 = vector.multi_reduction <add>, %29, %cst_15 [1] : vector<2x8x32xf32> to vector<2x32xf32>
    %c0_16 = arith.constant 0 : index
    %c0_17 = arith.constant 0 : index
    %31 = vector.load %arg7[%c0_16, %c0_17] : memref<2x32xf32, #tpu.memory_space<vmem>>, vector<2x32xf32>
    tpu.vector_store %arg7[%c0_16, %c0_17], %30 {strides = array<i32>} : memref<2x32xf32, #tpu.memory_space<vmem>>, vector<2x32xf32>,
    return
  }
  func.func @transform_0(%arg0: i32) -> (i32, i32, i32) {
    %c0_i32 = arith.constant 0 : i32
    %c0_i32_0 = arith.constant 0 : i32
    %c0_i32_1 = arith.constant 0 : i32
    return %arg0, %c0_i32, %c0_i32_0 : i32, i32, i32
  }
  func.func @transform_1(%arg0: i32) -> (i32, i32) {
    %c0_i32 = arith.constant 0 : i32
    %c0_i32_0 = arith.constant 0 : i32
    return %arg0, %c0_i32 : i32, i32
  }
  func.func @transform_2(%arg0: i32) -> (i32, i32) {
    %c0_i32 = arith.constant 0 : i32
    %c0_i32_0 = arith.constant 0 : i32
    %c0_i32_1 = arith.constant 0 : i32
    return %c0_i32, %c0_i32_0 : i32, i32
  }
  func.func @transform_3(%arg0: i32) -> (i32, i32) {
    %c0_i32 = arith.constant 0 : i32
    %c0_i32_0 = arith.constant 0 : i32
    %c0_i32_1 = arith.constant 0 : i32
    return %c0_i32, %c0_i32_0 : i32, i32
  }
  func.func @transform_4(%arg0: i32) -> (i32, i32) {
    %c0_i32 = arith.constant 0 : i32
    %c0_i32_0 = arith.constant 0 : i32
    %c0_i32_1 = arith.constant 0 : i32
    return %c0_i32, %c0_i32_0 : i32, i32
  }
  func.func @transform_5(%arg0: i32) -> (i32, i32) {
    %c0_i32 = arith.constant 0 : i32
    %c0_i32_0 = arith.constant 0 : i32
    %c0_i32_1 = arith.constant 0 : i32
    return %c0_i32, %c0_i32_0 : i32, i32
  }
  func.func @transform_6(%arg0: i32) -> (i32, i32) {
    %c0_i32 = arith.constant 0 : i32
    %c0_i32_0 = arith.constant 0 : i32
    return %arg0, %c0_i32 : i32, i32
  }
}

</mosaic_0001>

<bundles_post_ra>
// kernel: tpu_custom_call.1
= control target key start
LH: loop header
LB: loop body
LE: loop exit
PB: predicated region body
PF: predicated region fallthrough
CT: control target
= control target key end

     0   :  { %s434_s0 = inlined_call_operand.hbm [shape: f32[2,8,32], index: 0, kind: input, shape index: {}]   ;;  %s435_s1 = inlined_call_operand.vmem [shape: f32[2,8], index: 1, kind: input, shape index: {}]   ;;  %s436_s2 = inlined_call_operand.hbm [shape: f32[32,32], index: 2, kind: input, shape index: {}]   ;;  %s437_s3 = inlined_call_operand.vmem [shape: f32[1,32], index: 3, kind: input, shape index: {}]   ;;  %s438_s4 = inlined_call_operand.vmem [shape: f32[1,32], index: 4, kind: input, shape index: {}]   ;;  %s439_s5 = inlined_call_operand.<no memory space> [shape: f32[1,1], index: 5, kind: input, shape index: {}]   ;;  %s440_s6 = inlined_call_operand.hbm [shape: f32[2,32], index: 6, kind: output, shape index: {}]  }
   0x1   :  { %v11_v0 = vstv %s439_s5 }
   0x2   :  { %12 = vst [vmem:[#allocation2] sm:$0x1] %v11_v0 }
   0x3   :  { %13 = vsyncpa [#allocation4], 0 }
   0x4   :  { %14 = vsyncpa [#allocation7], 0 }
   0x5   :  { %15 = vsyncpa [#allocation5], 0  ;;  %s20_s25 = sshll.u32 %s434_s0, 4  ;;  %s356_s26 = smov [#allocation3]   ;;  %s21_s25 = int_to_ptr.hbm [resolvable:$true] %s20_s25 }
   0x6   :  { %s22_s27 = sshll.u32 %s356_s26, 4  ;;  %s35_s30 = sshll.u32 %s436_s2, 4  ;;  %s23_s27 = int_to_ptr.vmem [resolvable:$true] %s22_s27  ;;  %s36_s30 = int_to_ptr.hbm [resolvable:$true] %s35_s30 }
   0x7   :  { %s357_s7 = smov 128   ;;  %s358_s8 = smov 8  }
   0x8   :  { %28 = dma.hbm_to_vmem [thread:$0]  %s21_s25, 256, %s23_s27, [#allocation4], %s357_s7, %s357_s7, %s358_s8  }
   0x9   :  { %s359_s5 = smov [#allocation6]  }
   0xa   :  { %s37_s9 = sshll.u32 %s359_s5, 4  ;;  %s38_s9 = int_to_ptr.vmem [resolvable:$true] %s37_s9 }
   0xb   :  { %43 = dma.hbm_to_vmem [thread:$0]  %s36_s30, 512, %s38_s9, [#allocation7], %s357_s7, %s357_s7, %s358_s8  }
   0xc   :  { %350 = dma.done.wait [#allocation4], 256  }
   0xd   :  { %351 = vsyncadd [#allocation4], 4294967040 }
   0xe   :  { %352 = dma.done.wait [#allocation7], 512  }
   0xf   :  { %353 = vsyncadd [#allocation7], 4294966784  ;;  %v63_v1 = vld [vmem:[#allocation6 + $0x18] sm:$0xff]  ;;  %v62_v2 = vld [vmem:[#allocation6 + $0x10] sm:$0xff]  ;;  %vm68_vm0 = vcmask 261120   ;;  %v124_v7 = vlaneseq  ;;  %v360_v25 = vmov 0  }
  0x10   :  { %87 = vmatpush.msra.mxu0 %v63_v1  ;;  %248 = vmatpush.msra.mxu1 %v63_v1  ;;  %v61_v3 = vld [vmem:[#allocation6 + $0x8] sm:$0xff]  ;;  %v60_v4 = vld [vmem:[#allocation6] sm:$0xff]  ;;  %v406_v5 = vld [vmem:[#allocation3] sm:$0xff]  ;;  %vm153_vm1 = vcmask 1041409   ;;  %vm156_vm2 = vcmask 58368   ;;  %s235_s16 = sshll.u32 %s440_s6, 4  ;;  %s236_s16 = int_to_ptr.hbm [resolvable:$true] %s235_s16 }
  0x11   :  { %v408_v6 = vld [vmem:[#allocation3 + $0x8] sm:$0xff]  ;;  %v125_v8 = vshrl.u32 %v124_v7, 7  ;;  %v121_v9 = vld [vmem:[%s435_s1] sm:$0x3]  ;;  %261 = vset.pattern.permute.xlu2 %v360_v25  ;;  %263 = vset.pattern.permute.xlu0 %v360_v25  ;;  %v150_v40 = vand.u32 127, %v124_v7  ;;  %vm226_vm11 = vcmask 254976  }
  0x12   :  { %88 = vmatpush.msra.mxu0 %v62_v2  ;;  %249 = vmatpush.msra.mxu1 %v62_v2  ;;  %v123_v10 = vperm.slane %v121_v9, 0  ;;  %v130_v11 = vperm.slane %v121_v9, 1  ;;  %v112_v12 = vld [vmem:[#allocation2] sm:$0x1] }
  0x13   :  { %260 = vset.pattern.permute.xlu1 %v125_v8  ;;  %252 = vpush %v112_v12  ;;  %v264_v13 = vld [vmem:[%s437_s3] ss:$0 sm:$0xff]  ;;  %s361_s3 = smov [#allocation8]  }
  0x14   :  { %89 = vmatpush.msra.mxu0 %v61_v3  ;;  %250 = vmatpush.msra.mxu1 %v61_v3  ;;  %v265_v18 = vld [vmem:[%s438_s4] ss:$0 sm:$0xff]  ;;  %s233_s4 = sshll.u32 %s361_s3, 4  ;;  %s234_s4 = int_to_ptr.vmem [resolvable:$true] %s233_s4 }
  0x16   :  { %90 = vmatpush.msra.mxu0 %v60_v4  ;;  %251 = vmatpush.msra.mxu1 %v60_v4 }
  0x17   :  { %246 = vmatmul.msk.f32.vlgmr.msra.gmra.mxu0 %vm68_vm0, %v406_v5  ;;  %247 = vmatmul.msk.f32.vlgmr.msra.gmra.mxu1 %vm68_vm0, %v408_v6 }
  0x1b   :  { %128 = vperm.xlu1 %260, %v123_v10  }
  0x23   :  { %135 = vperm.xlu1 %260, %v130_v11  }
  0x2b   :  { %262 = vset.pattern.permute.xlu1 %v360_v25 }
  0x44   :  { %s253_s1 = spop %252 }
  0x45   :  { %v114_v26 = vstv %s253_s1 }
  0x8d   :  { %v129_v31 = vpop.permute.xlu1 %128 }
  0x94   :  { %v92_v14 = vpop.f32.mrf.mxu0  ;;  %v95_v15 = vpop.f32.mrf.mxu1 }
  0x95   :  { %v93_v16 = vadd.f32 %v264_v13, %v92_v14  ;;  %v96_v17 = vadd.f32 %v264_v13, %v95_v15  ;;  %v136_v37 = vpop.permute.xlu1 %135 }
  0x97   :  { %266 = vtanh.f32 %v93_v16 }
  0x98   :  { %268 = vtanh.f32 %v96_v17 }
  0x9d   :  { %v267_v19 = vpop.eup %266 }
  0x9e   :  { %v104_v20 = vmul.f32 %v267_v19, %v265_v18  ;;  %v269_v21 = vpop.eup %268 }
  0x9f   :  { %v105_v23 = vmul.f32 %v269_v21, %v265_v18 }
  0xa0   :  { %v106_v22 = vsel %vm68_vm0, %v104_v20, 0.0 }
  0xa1   :  { %107 = vadd.xlane.f32.xlu0 %v106_v22  ;;  %v109_v24 = vsel %vm68_vm0, %v105_v23, 0.0 }
  0xa9   :  { %110 = vadd.xlane.f32.xlu0 %v109_v24 }
 0x114   :  { %v108_v27 = vpop.xlane.xlu0 %107 }
 0x115   :  { %v115_v28 = vadd.f32 %v114_v26, %v108_v27 }
 0x117   :  { %v117_v29 = vmul.f32 1.442695, %v115_v28 }
 0x119   :  { %270 = vpow2.f32 %v117_v29 }
 0x11c   :  { %v111_v30 = vpop.xlane.xlu0 %110 }
 0x11d   :  { %v116_v32 = vadd.f32 %v114_v26, %v111_v30 }
 0x11f   :  { %v271_v33 = vpop.eup %270  ;;  %v119_v34 = vmul.f32 1.442695, %v116_v32 }
 0x120   :  { %v139_v35 = vmul.f32 %v271_v33, %v129_v31 }
 0x121   :  { %272 = vpow2.f32 %v119_v34 }
 0x122   :  { %144 = vperm.xlu2 %261, %v139_v35  }
 0x127   :  { %v273_v36 = vpop.eup %272 }
 0x128   :  { %v140_v38 = vmul.f32 %v273_v36, %v136_v37 }
 0x12a   :  { %147 = vperm.xlu2 %261, %v140_v38  }
 0x17c   :  { %v145_v39 = vpop.permute.xlu2 %144 }
 0x17d   :  { %v151_v42 = vperm.slane %v145_v39, %v150_v40 }
 0x184   :  { %v148_v41 = vpop.permute.xlu2 %147 }
 0x185   :  { %v152_v43 = vperm.slane %v148_v41, %v150_v40 }
 0x187   :  { %v154_v44 = vsel %vm153_vm1, %v152_v43, %v151_v42 }
 0x188   :  { %v157_v45 = vsel %vm156_vm2, %v154_v44, 0.0 }
 0x189   :  { %158 = vadd.xlane.f32.xlu0 %v157_v45 }
 0x1fc   :  { %v159_v46 = vpop.xlane.xlu0 %158 }
 0x1fd   :  { %v160_v47 = vadd.f32 1e-08, %v159_v46 }
 0x1ff   :  { %v162_v48 = vperm.slane %v160_v47, 0  ;;  %v163_v49 = vperm.slane %v160_v47, 1 }
 0x201   :  { %274 = vrcp.f32 %v162_v48  ;;  %v177_v56 = vand.u32 2147483648, %v162_v48  ;;  %v192_v57 = vand.u32 2147483648, %v163_v49  ;;  %v175_v59 = vand.u32 2147483647, %v162_v48 }
 0x202   :  { %276 = vrcp.f32 %v163_v49  ;;  %v190_v61 = vand.u32 2147483647, %v163_v49  ;;  %vm171_vm5 = vweird.f32 %v162_v48  ;;  %vm186_vm6 = vweird.f32 %v163_v49 }
 0x203   :  { %v178_v0 = vor.u32 1.1754944e-38, %v177_v56  ;;  %v193_v1 = vor.u32 1.1754944e-38, %v192_v57  ;;  %vm176_vm9 = vcmp.eq.f32.partialorder %v175_v59, 8.507059e+37 }
 0x204   :  { %vm191_vm10 = vcmp.eq.f32.partialorder %v190_v61, 8.507059e+37 }
 0x207   :  { %v275_v50 = vpop.eup %274 }
 0x208   :  { %v277_v51 = vpop.eup %276  ;;  %v167_v52 = vmul.f32 %v275_v50, %v162_v48  ;;  %vm172_vm3 = vweird.f32 %v275_v50 }
 0x209   :  { %v182_v53 = vmul.f32 %v277_v51, %v163_v49  ;;  %vm187_vm4 = vweird.f32 %v277_v51  ;;  %vm173_vm7 = vmor %vm171_vm5, %vm172_vm3 }
 0x20a   :  { %v168_v54 = vsub.f32 1.0, %v167_v52  ;;  %vm188_vm8 = vmor %vm186_vm6, %vm187_vm4 }
 0x20b   :  { %v183_v55 = vsub.f32 1.0, %v182_v53 }
 0x20c   :  { %v169_v58 = vmul.f32 %v275_v50, %v168_v54 }
 0x20d   :  { %v184_v60 = vmul.f32 %v277_v51, %v183_v55 }
 0x20e   :  { %v170_v62 = vadd.f32 %v275_v50, %v169_v58 }
 0x20f   :  { %v185_v63 = vadd.f32 %v277_v51, %v184_v60 }
 0x210   :  { %v174_v2 = vsel %vm173_vm7, %v275_v50, %v170_v62 }
 0x211   :  { %v189_v3 = vsel %vm188_vm8, %v277_v51, %v185_v63  ;;  %v179_v4 = vsel %vm176_vm9, %v178_v0, %v174_v2 }
 0x212   :  { %v194_v7 = vsel %vm191_vm10, %v193_v1, %v189_v3  ;;  %v180_v8 = vmul.f32 %v179_v4, %v139_v35 }
 0x213   :  { %v195_v9 = vmul.f32 %v194_v7, %v140_v38 }
 0x214   :  { %198 = vperm.xlu1 %262, %v180_v8  }
 0x215   :  { %203 = vperm.xlu2 %261, %v195_v9  }
 0x26f   :  { %v204_v10 = vpop.permute.xlu2 %203 }
 0x270   :  { %v207_v11 = vmul.f32 %v204_v10, %v408_v6 }
 0x272   :  { %v215_v12 = vsel %vm68_vm0, %v207_v11, 0.0 }
 0x273   :  { %v216_v13 = vrot.slane %v215_v12, 4 }
 0x275   :  { %v217_v14 = vadd.f32 %v216_v13, %v215_v12 }
 0x277   :  { %v218_v17 = vrot.slane %v217_v14, 2 }
 0x279   :  { %v219_v20 = vadd.f32 %v218_v17, %v217_v14 }
 0x27b   :  { %v220_v23 = vrot.slane %v219_v20, 1 }
 0x27d   :  { %v221_v6 = vadd.f32 %v220_v23, %v219_v20 }
 0x286   :  { %v199_v15 = vpop.permute.xlu1 %198 }
 0x287   :  { %v206_v16 = vmul.f32 %v199_v15, %v406_v5 }
 0x289   :  { %v208_v18 = vsel %vm68_vm0, %v206_v16, 0.0 }
 0x28a   :  { %v209_v19 = vrot.slane %v208_v18, 4 }
 0x28c   :  { %v210_v21 = vadd.f32 %v209_v19, %v208_v18 }
 0x28e   :  { %v211_v22 = vrot.slane %v210_v21, 2 }
 0x290   :  { %v212_v24 = vadd.f32 %v211_v22, %v210_v21 }
 0x292   :  { %v213_v25 = vrot.slane %v212_v24, 1 }
 0x294   :  { %v214_v26 = vadd.f32 %v213_v25, %v212_v24 }
 0x296   :  { %v224_v5 = vsel %vm153_vm1, %v221_v6, %v214_v26 }
 0x297   :  { %227 = vst.msk [vmem:[#allocation8] sm:$0x3] %vm226_vm11, %v224_v5 }
 0x298   :  { %238 = dma.vmem_to_hbm [thread:$0]  %s234_s4, 32, %s236_s16, [#allocation5]  }
 0x299   :  { %354 = dma.done.wait [#allocation5], 32  }
 0x29a   :  { %355 = vsyncadd [#allocation5], 4294967264 }
 0x29b   :  { %243 = vsyncpa [#allocation4], 1 }
 0x29c   :  { %244 = vsyncpa [#allocation7], 1 }
 0x29d   :  { %245 = vsyncpa [#allocation5], 1 }

</bundles_post_ra>
